<compile_context>
chip_gen: v7x
topology: tpu7x:2x2x1
jax: 0.10.0
libtpu: 0.0.40
codegen_flags: <defaults>
</compile_context>

<pallas_src>
import functools

import jax
import jax.numpy as jnp
from jax.experimental import pallas as pl
from jax.experimental.pallas import tpu as pltpu


def _pool_linear_kernel(x_ref, w_ref, b_ref, o_ref, *, pooling_style, inv_s):
    # x_ref: (TILE_B, S, H) f32, w_ref: (H, C_pad) f32, b_ref: (1, C_pad) f32,
    # o_ref: (TILE_B, C_pad) f32
    x = x_ref[...]
    if pooling_style == "avg":
        # Sum over the sublane (S) axis, then one scalar multiply -> (TILE_B, H).
        pooled = jnp.sum(x, axis=1) * inv_s
    else:  # 'max'
        pooled = jnp.max(x, axis=1)
    # Contraction on the last dim of both operands feeds the MXU directly —
    # no in-kernel transpose / relayout of the weight tile.
    logits = jnp.dot(pooled, w_ref[...], preferred_element_type=jnp.float32)
    o_ref[...] = (logits + b_ref[...]).astype(o_ref.dtype)


def _choose_tile_b(B, S, H, C_pad, vmem_budget_bytes=24 * 1024 * 1024):
    """Largest batch tile that keeps double-buffered in/out under budget."""
    per_row = (2 * S * H + 2 * C_pad) * 4      # f32 bytes per batch row (2x buffered)
    cap = max(8, vmem_budget_bytes // max(per_row, 1))
    if B <= cap:
        return B                                # single tile == full dim -> always legal
    tile_b = min(cap, 1024)                     # ~512-1024 rows hits ~85% of HBM BW
    return max(8, (tile_b // 8) * 8)            # keep output sublane dim a multiple of 8


def torch_model_forward(x, weight, bias, pooling_style="avg"):
    """x: (B, S, H) f32, weight: (C, H), bias: (C,) -> (B, C) f32."""
    assert pooling_style in ("avg", "max")
    B, S, H = x.shape
    C = weight.shape[0]

    # Lane-dense output: pad the class dim to a multiple of 128 so stores are
    # unmasked vst (not vst.msk) and the MXU result vregs are fully used.
    C_pad = pl.cdiv(C, 128) * 128
    # One-time wrapper-side transpose + pad: (C, H) -> (H, C_pad).
    w_hc = jnp.zeros((H, C_pad), dtype=jnp.float32).at[:, :C].set(
        weight.astype(jnp.float32).T)
    b2d = jnp.zeros((1, C_pad), dtype=jnp.float32).at[:, :C].set(
        bias.astype(jnp.float32))

    tile_b = _choose_tile_b(B, S, H, C_pad)
    B_pad = pl.cdiv(B, tile_b) * tile_b
    x_p = x if B_pad == B else jnp.pad(x, ((0, B_pad - B), (0, 0), (0, 0)))

    kernel = functools.partial(
        _pool_linear_kernel, pooling_style=pooling_style, inv_s=float(1.0 / S))

    out = pl.pallas_call(
        kernel,
        out_shape=jax.ShapeDtypeStruct((B_pad, C_pad), jnp.float32),
        grid=(B_pad // tile_b,),
        in_specs=[
            # Last two block dims (S, H) equal the full array dims -> legal
            # under the (8,128) rule; only B is tiled (pipelined).
            pl.BlockSpec((tile_b, S, H), lambda i: (i, 0, 0)),
            pl.BlockSpec((H, C_pad), lambda i: (0, 0)),   # resident weight
            pl.BlockSpec((1, C_pad), lambda i: (0, 0)),   # resident bias
        ],
        out_specs=pl.BlockSpec((tile_b, C_pad), lambda i: (i, 0)),
        compiler_params=pltpu.CompilerParams(
            dimension_semantics=("parallel",),            # 2x on v7x's 2 TCs
        ),
        cost_estimate=pl.CostEstimate(
            flops=2 * B_pad * H * C_pad + B_pad * S * H,
            transcendentals=0,
            bytes_accessed=(B_pad * S * H + H * C_pad + B_pad * C_pad) * 4,
        ),
    )(x_p, w_hc, b2d)

    return out[:B, :C]


if __name__ == "__main__":
    # config-implied small sizes: embedding_dim(hidden)=32, class_num=4,
    # seq=8, batch=2; vocab_type='words' -> avg pooling.
    B, S, H, C = 2, 8, 32, 4

    key = jax.random.PRNGKey(0)
    kx, kw, kb = jax.random.split(key, 3)

    x = jax.random.normal(kx, (B, S, H), dtype=jnp.float32)
    weight = jax.random.normal(kw, (C, H), dtype=jnp.float32) * 0.1
    bias = jax.random.normal(kb, (C,), dtype=jnp.float32) * 0.1

    out = torch_model_forward(x, weight, bias, pooling_style="avg")
    out = jax.block_until_ready(out)

    # Reference check in plain JAX (same semantics as the torch forward).
    ref = jnp.mean(x, axis=1) @ weight.T + bias
    assert out.shape == (B, C)
    assert jnp.allclose(out, ref, atol=1e-5, rtol=1e-5)

    print("KERNEL_OK")
</pallas_src>

<mosaic_0001>
module attributes {stable_mosaic.version = 11 : i64} {
  func.func @_pool_linear_kernel(%arg0: i32, %arg1: memref<2x8x32xf32, #tpu.memory_space<vmem>>, %arg2: memref<32x128xf32, #tpu.memory_space<vmem>>, %arg3: memref<1x128xf32, #tpu.memory_space<vmem>>, %arg4: memref<2x128xf32, #tpu.memory_space<vmem>>) attributes {dimension_semantics = [#tpu.dimension_semantics<parallel>], iteration_bounds = array<i64: 1>, scalar_prefetch = 0 : i64, scratch_operands = 0 : i64, tpu.core_type = #tpu.core_type<tc>, window_params = [{transform_indices = @transform_0, window_bounds = array<i64: 2, 8, 32>}, {pipeline_mode = #tpu.pipeline_mode<synchronous>, transform_indices = @transform_1, window_bounds = array<i64: 32, 128>}, {pipeline_mode = #tpu.pipeline_mode<synchronous>, transform_indices = @transform_2, window_bounds = array<i64: 1, 128>}, {transform_indices = @transform_3, window_bounds = array<i64: 2, 128>}]} {
    %c0 = arith.constant 0 : index
    %c0_0 = arith.constant 0 : index
    %c0_1 = arith.constant 0 : index
    %0 = vector.load %arg1[%c0, %c0_0, %c0_1] : memref<2x8x32xf32, #tpu.memory_space<vmem>>, vector<2x8x32xf32>
    %cst = arith.constant dense<0.000000e+00> : vector<2x32xf32>
    %1 = vector.multi_reduction <add>, %0, %cst [1] : vector<2x8x32xf32> to vector<2x32xf32>
    %cst_2 = arith.constant 1.250000e-01 : f32
    %2 = vector.broadcast %cst_2 : f32 to vector<2x32xf32>
    %3 = arith.mulf %1, %2 : vector<2x32xf32>
    %c0_3 = arith.constant 0 : index
    %c0_4 = arith.constant 0 : index
    %4 = vector.load %arg2[%c0_3, %c0_4] : memref<32x128xf32, #tpu.memory_space<vmem>>, vector<32x128xf32>
    %cst_5 = arith.constant dense<0.000000e+00> : vector<2x128xf32>
    %5 = tpu.matmul %3, %4, %cst_5 {dimension_numbers = #tpu.dot_dimension_numbers<[1], [0], [0], [1], [0, 0, 1, 1], [], []>} : vector<2x32xf32>, vector<32x128xf32>, vector<2x128xf32> -> vector<2x128xf32>
    %c0_6 = arith.constant 0 : index
    %c0_7 = arith.constant 0 : index
    %6 = vector.load %arg3[%c0_6, %c0_7] : memref<1x128xf32, #tpu.memory_space<vmem>>, vector<1x128xf32>
    %7 = vector.broadcast %6 : vector<1x128xf32> to vector<2x128xf32>
    %8 = arith.addf %5, %7 : vector<2x128xf32>
    %c0_8 = arith.constant 0 : index
    %c0_9 = arith.constant 0 : index
    %9 = vector.load %arg4[%c0_8, %c0_9] : memref<2x128xf32, #tpu.memory_space<vmem>>, vector<2x128xf32>
    tpu.vector_store %arg4[%c0_8, %c0_9], %8 {strides = array<i32>} : memref<2x128xf32, #tpu.memory_space<vmem>>, vector<2x128xf32>,
    return
  }
  func.func @transform_0(%arg0: i32) -> (i32, i32, i32) {
    %c0_i32 = arith.constant 0 : i32
    %c0_i32_0 = arith.constant 0 : i32
    %c0_i32_1 = arith.constant 0 : i32
    return %arg0, %c0_i32, %c0_i32_0 : i32, i32, i32
  }
  func.func @transform_1(%arg0: i32) -> (i32, i32) {
    %c0_i32 = arith.constant 0 : i32
    %c0_i32_0 = arith.constant 0 : i32
    %c0_i32_1 = arith.constant 0 : i32
    return %c0_i32, %c0_i32_0 : i32, i32
  }
  func.func @transform_2(%arg0: i32) -> (i32, i32) {
    %c0_i32 = arith.constant 0 : i32
    %c0_i32_0 = arith.constant 0 : i32
    %c0_i32_1 = arith.constant 0 : i32
    return %c0_i32, %c0_i32_0 : i32, i32
  }
  func.func @transform_3(%arg0: i32) -> (i32, i32) {
    %c0_i32 = arith.constant 0 : i32
    %c0_i32_0 = arith.constant 0 : i32
    return %arg0, %c0_i32 : i32, i32
  }
}

</mosaic_0001>

<bundles_post_ra>
// kernel: tpu_custom_call.1
= control target key start
LH: loop header
LB: loop body
LE: loop exit
PB: predicated region body
PF: predicated region fallthrough
CT: control target
= control target key end

     0   :  { %8 = vsyncpa [#allocation3], 0  ;;  %s340_s0 = inlined_call_operand.hbm [shape: f32[2,8,32], index: 0, kind: input, shape index: {}]   ;;  %s341_s1 = inlined_call_operand.hbm [shape: f32[32,128], index: 1, kind: input, shape index: {}]   ;;  %s342_s2 = inlined_call_operand.vmem [shape: f32[1,128], index: 2, kind: input, shape index: {}]   ;;  %s343_s3 = inlined_call_operand.hbm [shape: f32[2,128], index: 3, kind: output, shape index: {}]  }
   0x1   :  { %9 = vsyncpa [#allocation6], 0 }
   0x2   :  { %10 = vsyncpa [#allocation4], 0  ;;  %s270_s12 = smov [#allocation2]   ;;  %s198_s16 = scalar_lea.hbm %s340_s0, 256 }
   0x3   :  { %s16_s13 = sshll.u32 %s270_s12, 4  ;;  %p199_p0 = scmp.ne.s32.totalorder %s340_s0, %s198_s16  ;;  %s17_s13 = int_to_ptr.vmem [resolvable:$true] %s16_s13 }
   0x4   :  { %p202_p1 = scmp.lt.u32.totalorder %s198_s16, %s340_s0 }
   0x6   :  { %p204_p2 = pnand %p202_p1, %p199_p0 }
   0x8   :  { %207 = shalt.err (!%p204_p2)
}
   0x9   :  { %s208_s21 = scalar_lea.vmem %s17_s13, 256  ;;  %p213_p4 = scmp.lt.s32.totalorder %s17_s13, %s17_s13 }
   0xa   :  { %p209_p3 = scmp.ne.s32.totalorder %s17_s13, %s208_s21  ;;  %p214_p5 = scmp.lt.s32.totalorder %s208_s21, %s208_s21 }
   0xc   :  { %p215_p6 = por %p214_p5, %p213_p4 }
   0xe   :  { %p216_p7 = pnand %p215_p6, %p209_p3 }
  0x10   :  { %219 = shalt.err (!%p216_p7)
}
  0x11   :  { %s271_s22 = smov 128   ;;  %s272_s23 = smov 8  }
  0x12   :  { %22 = dma.hbm_to_vmem [thread:$0]  %s340_s0, 256, %s17_s13, [#allocation3], %s271_s22, %s271_s22, %s272_s23  }
  0x13   :  { %s273_s26 = smov [#allocation5]   ;;  %s220_s30 = scalar_lea.hbm %s341_s1, 512 }
  0x14   :  { %s28_s27 = sshll.u32 %s273_s26, 4  ;;  %p221_p8 = scmp.ne.s32.totalorder %s341_s1, %s220_s30  ;;  %s29_s27 = int_to_ptr.vmem [resolvable:$true] %s28_s27 }
  0x15   :  { %p224_p9 = scmp.lt.u32.totalorder %s220_s30, %s341_s1 }
  0x17   :  { %p226_p10 = pnand %p224_p9, %p221_p8 }
  0x19   :  { %229 = shalt.err (!%p226_p10)
}
  0x1a   :  { %s230_s8 = scalar_lea.vmem %s29_s27, 512  ;;  %p235_p12 = scmp.lt.s32.totalorder %s29_s27, %s29_s27 }
  0x1b   :  { %p231_p11 = scmp.ne.s32.totalorder %s29_s27, %s230_s8  ;;  %p236_p13 = scmp.lt.s32.totalorder %s230_s8, %s230_s8 }
  0x1d   :  { %p237_p0 = por %p236_p13, %p235_p12 }
  0x1f   :  { %p238_p1 = pnand %p237_p0, %p231_p11 }
  0x21   :  { %241 = shalt.err (!%p238_p1)
}
  0x22   :  { %34 = dma.hbm_to_vmem [thread:$0]  %s341_s1, 512, %s29_s27, [#allocation6], %s271_s22, %s271_s22, %s272_s23  }
  0x23   :  { %264 = dma.done.wait [#allocation3], 256  }
  0x24   :  { %265 = vsyncadd [#allocation3], 4294967040 }
  0x25   :  { %266 = dma.done.wait [#allocation6], 512  }
  0x26   :  { %267 = vsyncadd [#allocation6], 4294966784  ;;  %v274_v0 = vmov 0.0|0.0   ;;  %vm275_vm0 = vmmov 0   ;;  %v276_v1 = vmov 0.0   ;;  %vm45_vm1 = vcmask 261120  }
  0x27   :  { %184 = vmatprep.subr.bf16.mxu0 %v274_v0  ;;  %181 = vmatprep.mubr.msk.f32.mxu0 %vm275_vm0, %v276_v1  ;;  %v62_v2 = vld [vmem:[#allocation5] sm:$0xff]  ;;  %v63_v3 = vld [vmem:[#allocation5 + $0x8] sm:$0xff]  ;;  %v64_v4 = vld [vmem:[#allocation5 + $0x10] sm:$0xff]  ;;  %vm75_vm2 = vcmask 1041409   ;;  %s277_s11 = smov [#allocation7]  }
  0x28   :  { %v185_v5 = vpack.c.bf16 %v63_v3, %v62_v2  ;;  %v65_v6 = vld [vmem:[#allocation5 + $0x18] sm:$0xff]  ;;  %v43_v7 = vld [vmem:[#allocation2] sm:$0xff]  ;;  %s156_s12 = sshll.u32 %s277_s11, 4  ;;  %s157_s12 = int_to_ptr.vmem [resolvable:$true] %s156_s12 }
  0x29   :  { %v44_v8 = vld [vmem:[#allocation2 + $0x8] sm:$0xff]  ;;  %v46_v9 = vsel %vm45_vm1, %v43_v7, 0.0  ;;  %v188_v11 = vpack.c.bf16 %v65_v6, %v64_v4  ;;  %v166_v27 = vld [vmem:[%s342_s2] ss:$0 sm:$0xff]  ;;  %s242_s13 = scalar_lea.vmem %s157_s12, 32  ;;  %p247_p3 = scmp.lt.s32.totalorder %s157_s12, %s157_s12 }
  0x2a   :  { %v53_v10 = vsel %vm45_vm1, %v44_v8, 0.0  ;;  %186 = vmatpush3.bf16.msra.mxu0 %v185_v5  ;;  %v47_v12 = vrot.slane %v46_v9, 4  ;;  %p243_p2 = scmp.ne.s32.totalorder %s157_s12, %s242_s13  ;;  %p248_p4 = scmp.lt.s32.totalorder %s242_s13, %s242_s13 }
  0x2b   :  { %v54_v13 = vrot.slane %v53_v10, 4  ;;  %187 = vmatprep.subr.bf16.mxu0 %v274_v0 }
  0x2c   :  { %v48_v14 = vadd.f32 %v47_v12, %v46_v9  ;;  %p249_p5 = por %p248_p4, %p247_p3 }
  0x2d   :  { %v55_v15 = vadd.f32 %v54_v13, %v53_v10 }
  0x2e   :  { %189 = vmatpush3.bf16.msra.mxu0 %v188_v11  ;;  %v49_v16 = vrot.slane %v48_v14, 2  ;;  %p250_p6 = pnand %p249_p5, %p243_p2 }
  0x2f   :  { %v56_v17 = vrot.slane %v55_v15, 2 }
  0x30   :  { %v50_v18 = vadd.f32 %v49_v16, %v48_v14 }
  0x31   :  { %v57_v19 = vadd.f32 %v56_v17, %v55_v15 }
  0x32   :  { %v51_v20 = vrot.slane %v50_v18, 1 }
  0x33   :  { %v58_v21 = vrot.slane %v57_v19, 1 }
  0x34   :  { %v52_v22 = vadd.f32 %v51_v20, %v50_v18 }
  0x35   :  { %v59_v23 = vadd.f32 %v58_v21, %v57_v19 }
  0x36   :  { %v60_v24 = vmul.f32 0.125, %v52_v22 }
  0x37   :  { %v61_v25 = vmul.f32 0.125, %v59_v23 }
  0x39   :  { %v76_v26 = vsel %vm75_vm2, %v61_v25, %v60_v24 }
  0x3a   :  { %182 = vmatmul.mubr.msk.f32.vlgmr.msra.gmra.mrb[0].mxu0 %vm45_vm1, %v76_v26 }
 0x10d   :  { %v145_v28 = vpop.f32.mrb[0].mxu0 }
 0x10e   :  { %v146_v29 = vadd.f32 %v166_v27, %v145_v28  ;;  %v183_v30 = vpop.f32.mrb[1].mxu0 }
 0x110   :  { %149 = vst [vmem:[#allocation7] sm:$0x3] %v146_v29 }
 0x111   :  { %253 = shalt.err (!%p250_p6)
}
 0x112   :  { %s254_s16 = scalar_lea.hbm %s343_s3, 32 }
 0x113   :  { %p255_p7 = scmp.ne.s32.totalorder %s343_s3, %s254_s16  ;;  %p258_p8 = scmp.lt.u32.totalorder %s254_s16, %s343_s3 }
 0x115   :  { %p260_p9 = pnand %p258_p8, %p255_p7 }
 0x117   :  { %263 = shalt.err (!%p260_p9)
}
 0x118   :  { %159 = dma.vmem_to_hbm [thread:$0]  %s157_s12, 32, %s343_s3, [#allocation4]  }
 0x119   :  { %268 = dma.done.wait [#allocation4], 32  }
 0x11a   :  { %269 = vsyncadd [#allocation4], 4294967264 }
 0x11b   :  { %163 = vsyncpa [#allocation3], 1 }
 0x11c   :  { %164 = vsyncpa [#allocation6], 1 }
 0x11d   :  { %165 = vsyncpa [#allocation4], 1 }

</bundles_post_ra>
